<compile_context>
chip_gen: v5e
topology: v5e:2x2
jax: 0.10.0
libtpu: 0.0.40
codegen_flags: <defaults>
</compile_context>

<pallas_src>
import jax
import jax.numpy as jnp
from jax import lax
from jax.experimental import pallas as pl
from jax.experimental.pallas import tpu as pltpu

LABEL_PAD = 8  # pad the 2 NSP labels up to one sublane group


def _round_up(x, m):
    return (x + m - 1) // m * m


def _ceil_div(a, b):
    return -(-a // b)


def nsp_head_kernel(p_ref, w_ref, b_ref, out_ref):
    # (8, H) x (tm, H) contracting on H -> (8, tm) on the MXU, f32 accumulation.
    y = lax.dot_general(
        w_ref[...], p_ref[...],
        dimension_numbers=(((1,), (1,)), ((), ())),
        preferred_element_type=jnp.float32)
    out_ref[...] = (y + b_ref[...]).astype(out_ref.dtype)


def prepare_nsp_params(weight, bias, *, act_dtype=None):
    """One-time parameter prep (hoist out of the per-forward path).

    weight: [2, H] (PyTorch nn.Linear layout), bias: [2]
    Returns (w8, b8): [8, H] in the activation dtype, [8, 1] f32.
    """
    n_labels, H = weight.shape
    assert n_labels <= LABEL_PAD
    dt = jnp.dtype(act_dtype) if act_dtype is not None else weight.dtype
    w8 = jnp.zeros((LABEL_PAD, H), dt).at[:n_labels, :].set(weight.astype(dt))
    b8 = jnp.zeros((LABEL_PAD, 1), jnp.float32).at[:n_labels, 0].set(
        bias.astype(jnp.float32))
    return w8, b8


def _choose_row_tile(B, H, act_itemsize, row_tile, vmem_budget=12 << 20):
    """Largest row tile (multiple of 128) whose double-buffered footprint fits
    the most conservative scoped-VMEM default, with >= 2 grid steps so both
    v7x TensorCores get work. Small batches use a single full-dim block."""
    if B <= 128:
        return B
    tm = max(128, (min(row_tile, 1024) // 128) * 128)

    def footprint(t):
        return (2 * t * H * act_itemsize            # double-buffered activation tiles
                + 2 * LABEL_PAD * t * 4             # double-buffered (8, t) f32 output
                + 2 * LABEL_PAD * H * act_itemsize  # resident weight pipeline bufs
                + 2 * LABEL_PAD * 4)                # bias

    while tm > 128 and footprint(tm) > vmem_budget:
        tm -= 128
    while tm > 128 and _ceil_div(B, tm) < 2:        # keep both v7x TCs busy
        tm -= 128
    return tm


def nsp_head_forward(pooled_output, w8, b8, *, n_labels=2, row_tile=1024):
    """FNetOnlyNSPHead.forward with pre-padded params. Returns [B, n_labels] f32."""
    B, H = pooled_output.shape
    assert w8.shape == (LABEL_PAD, H) and b8.shape == (LABEL_PAD, 1)

    # Small batches: pad rows to a sublane multiple (<= 7 extra rows, negligible).
    # Large batches: no padding copy at all; ragged last tile handled by Pallas.
    if B <= 128 and B % 8 != 0:
        Bp = _round_up(B, 8)
        x = jnp.zeros((Bp, H), pooled_output.dtype).at[:B, :].set(pooled_output)
    else:
        Bp = B
        x = pooled_output

    tm = _choose_row_tile(Bp, H, x.dtype.itemsize, row_tile)
    grid = (_ceil_div(Bp, tm),)

    flops = 2 * B * H * n_labels                    # real work, not padded work
    bytes_accessed = (x.size * x.dtype.itemsize
                      + w8.size * w8.dtype.itemsize
                      + b8.size * 4
                      + LABEL_PAD * Bp * 4)

    out_t = pl.pallas_call(
        nsp_head_kernel,
        out_shape=jax.ShapeDtypeStruct((LABEL_PAD, Bp), jnp.float32),
        grid_spec=pltpu.PrefetchScalarGridSpec(
            num_scalar_prefetch=0,
            grid=grid,
            in_specs=[
                # Activations: streamed per row tile.
                pl.BlockSpec((tm, H), lambda i: (i, 0)),
                # Weight / bias: tiny, same block for every grid point (resident).
                pl.BlockSpec((LABEL_PAD, H), lambda i: (0, 0)),
                pl.BlockSpec((LABEL_PAD, 1), lambda i: (0, 0)),
            ],
            out_specs=pl.BlockSpec((LABEL_PAD, tm), lambda i: (0, i)),
        ),
        compiler_params=pltpu.CompilerParams(
            dimension_semantics=("parallel",),      # shard row tiles across v7x TCs
        ),
        cost_estimate=pl.CostEstimate(
            flops=flops, transcendentals=0, bytes_accessed=bytes_accessed),
    )(x, w8, b8)

    # (8, Bp) transposed logits -> (B, n_labels); tiny slice + transpose outside.
    return out_t[:n_labels, :B].T


def fnet_only_nsp_head(pooled_output, weight, bias, *, row_tile=1024):
    """Convenience wrapper. Prefer calling prepare_nsp_params once at load time
    and nsp_head_forward per call."""
    w8, b8 = prepare_nsp_params(weight, bias, act_dtype=pooled_output.dtype)
    return nsp_head_forward(pooled_output, w8, b8,
                            n_labels=weight.shape[0], row_tile=row_tile)


def _reference(pooled_output, weight, bias):
    # PyTorch nn.Linear: y = x @ W.T + b
    return (pooled_output.astype(jnp.float32) @ weight.astype(jnp.float32).T
            + bias.astype(jnp.float32))


if __name__ == "__main__":
    B, H = 2, 32  # small shapes consistent with the module (batch=2, hidden=32)

    key = jax.random.PRNGKey(0)
    k_w, k_b, k_x = jax.random.split(key, 3)

    # Deterministic synthetic parameters in PyTorch Linear layout.
    weight = jax.random.normal(k_w, (2, H), jnp.float32) * 0.02   # (out, in)
    bias = jax.random.normal(k_b, (2,), jnp.float32) * 0.02
    pooled_output = jax.random.normal(k_x, (B, H), jnp.float32)

    # One-time parameter prep (hoisted out of the per-call path).
    w8, b8 = prepare_nsp_params(weight, bias, act_dtype=pooled_output.dtype)

    seq_relationship_score = nsp_head_forward(pooled_output, w8, b8, n_labels=2)
    jax.block_until_ready(seq_relationship_score)

    ref = _reference(pooled_output, weight, bias)
    assert seq_relationship_score.shape == (B, 2)
    assert seq_relationship_score.dtype == jnp.float32
    assert jnp.allclose(seq_relationship_score, ref, atol=1e-5, rtol=1e-5)

    print("KERNEL_OK")
</pallas_src>

<mosaic_0001>
module attributes {stable_mosaic.version = 11 : i64} {
  func.func @nsp_head_kernel(%arg0: i32, %arg1: memref<8x32xf32, #tpu.memory_space<vmem>>, %arg2: memref<8x32xf32, #tpu.memory_space<vmem>>, %arg3: memref<8x1xf32, #tpu.memory_space<vmem>>, %arg4: memref<8x8xf32, #tpu.memory_space<vmem>>) attributes {dimension_semantics = [#tpu.dimension_semantics<parallel>], iteration_bounds = array<i64: 1>, scalar_prefetch = 0 : i64, scratch_operands = 0 : i64, tpu.core_type = #tpu.core_type<tc>, window_params = [{transform_indices = @transform_0, window_bounds = array<i64: 8, 32>}, {pipeline_mode = #tpu.pipeline_mode<synchronous>, transform_indices = @transform_1, window_bounds = array<i64: 8, 32>}, {pipeline_mode = #tpu.pipeline_mode<synchronous>, transform_indices = @transform_2, window_bounds = array<i64: 8, 1>}, {transform_indices = @transform_3, window_bounds = array<i64: 8, 8>}]} {
    %c0 = arith.constant 0 : index
    %c0_0 = arith.constant 0 : index
    %0 = vector.load %arg2[%c0, %c0_0] : memref<8x32xf32, #tpu.memory_space<vmem>>, vector<8x32xf32>
    %c0_1 = arith.constant 0 : index
    %c0_2 = arith.constant 0 : index
    %1 = vector.load %arg1[%c0_1, %c0_2] : memref<8x32xf32, #tpu.memory_space<vmem>>, vector<8x32xf32>
    %cst = arith.constant dense<0.000000e+00> : vector<8x8xf32>
    %2 = tpu.matmul %0, %1, %cst {dimension_numbers = #tpu.dot_dimension_numbers<[1], [1], [0], [0], [0, 0, 1, 0], [], []>} : vector<8x32xf32>, vector<8x32xf32>, vector<8x8xf32> -> vector<8x8xf32>
    %c0_3 = arith.constant 0 : index
    %c0_4 = arith.constant 0 : index
    %3 = vector.load %arg3[%c0_3, %c0_4] : memref<8x1xf32, #tpu.memory_space<vmem>>, vector<8x1xf32>
    %4 = vector.broadcast %3 : vector<8x1xf32> to vector<8x8xf32>
    %5 = arith.addf %2, %4 : vector<8x8xf32>
    %c0_5 = arith.constant 0 : index
    %c0_6 = arith.constant 0 : index
    %6 = vector.load %arg4[%c0_5, %c0_6] : memref<8x8xf32, #tpu.memory_space<vmem>>, vector<8x8xf32>
    tpu.vector_store %arg4[%c0_5, %c0_6], %5 {strides = array<i32>} : memref<8x8xf32, #tpu.memory_space<vmem>>, vector<8x8xf32>,
    return
  }
  func.func @transform_0(%arg0: i32) -> (i32, i32) {
    %c0_i32 = arith.constant 0 : i32
    %c0_i32_0 = arith.constant 0 : i32
    return %arg0, %c0_i32 : i32, i32
  }
  func.func @transform_1(%arg0: i32) -> (i32, i32) {
    %c0_i32 = arith.constant 0 : i32
    %c0_i32_0 = arith.constant 0 : i32
    %c0_i32_1 = arith.constant 0 : i32
    return %c0_i32, %c0_i32_0 : i32, i32
  }
  func.func @transform_2(%arg0: i32) -> (i32, i32) {
    %c0_i32 = arith.constant 0 : i32
    %c0_i32_0 = arith.constant 0 : i32
    %c0_i32_1 = arith.constant 0 : i32
    return %c0_i32, %c0_i32_0 : i32, i32
  }
  func.func @transform_3(%arg0: i32) -> (i32, i32) {
    %c0_i32 = arith.constant 0 : i32
    %c0_i32_0 = arith.constant 0 : i32
    return %c0_i32, %arg0 : i32, i32
  }
}

</mosaic_0001>

<bundles_post_ra>
// kernel: tpu_custom_call.1
= control target key start
LH: loop header
LB: loop body
LE: loop exit
PB: predicated region body
PF: predicated region fallthrough
CT: control target
= control target key end

     0   :  { %8 = vsyncpa [#allocation3], 0  ;;  %s176_s0 = inlined_call_operand.vmem [shape: f32[8,32], index: 0, kind: input, shape index: {}]   ;;  %s177_s1 = inlined_call_operand.hbm [shape: f32[8,32], index: 1, kind: input, shape index: {}]   ;;  %s178_s2 = inlined_call_operand.vmem [shape: f32[8,1], index: 2, kind: input, shape index: {}]   ;;  %s179_s3 = inlined_call_operand.hbm [shape: f32[8,8], index: 3, kind: output, shape index: {}]  }
   0x1   :  { %9 = vsyncpa [#allocation4], 0  ;;  %s17_s14 = sshll.u32 %s177_s1, 4  ;;  %s141_s15 = smov [#allocation2]   ;;  %s18_s14 = int_to_ptr.hbm [resolvable:$true] %s17_s14 }
   0x2   :  { %s19_s16 = sshll.u32 %s141_s15, 4  ;;  %s20_s16 = int_to_ptr.vmem [resolvable:$true] %s19_s16 }
   0x3   :  { %22 = dma.hbm_to_vmem [thread:$0]  %s18_s14, 128, %s20_s16, [#allocation3]  }
   0x4   :  { %137 = dma.done.wait [#allocation3], 128  }
   0x5   :  { %138 = vsyncadd [#allocation3], 4294967168  ;;  %v142_v0 = vmov 0   ;;  %vm37_vm0 = vcmask 261120   ;;  %v30_v1 = vld [vmem:[%s176_s0] sm:$0xff]  ;;  %s143_s1 = smov [#allocation5]  }
   0x6   :  { %88 = vset.pattern.permute.xlu0 %v142_v0  ;;  %v31_v2 = vld [vmem:[%s178_s2] sm:$0xff]  ;;  %83 = vmatpush.xpose.msk.msra.mxu0 %vm37_vm0, %v30_v1  ;;  %s71_s21 = sshll.u32 %s143_s1, 4  ;;  %s73_s24 = sshll.u32 %s179_s3, 4  ;;  %vm64_vm1 = vcmask 64512   ;;  %s72_s21 = int_to_ptr.vmem [resolvable:$true] %s71_s21  ;;  %s74_s24 = int_to_ptr.hbm [resolvable:$true] %s73_s24 }
   0x7   :  { %v29_v3 = vld [vmem:[#allocation2] sm:$0xff]  ;;  %34 = vperm.xlu0 %88, %v31_v2  }
   0x9   :  { %84 = vmatmul.msk.f32.vlgmr.msra.gmra.mxu0 %vm37_vm0, %v29_v3 }
  0x79   :  { %v35_v4 = vpop.permute.xlu0 %34 }
  0x86   :  { %v61_v5 = vpop.f32.mrf.mxu0 }
  0x87   :  { %v62_v6 = vadd.f32 %v61_v5, %v35_v4 }
  0x89   :  { %65 = vst.msk [vmem:[#allocation5] sm:$0xff] %vm64_vm1, %v62_v6 }
  0x8a   :  { %76 = dma.vmem_to_hbm [thread:$0]  %s72_s21, 128, %s74_s24, [#allocation4]  }
  0x8b   :  { %139 = dma.done.wait [#allocation4], 128  }
  0x8c   :  { %140 = vsyncadd [#allocation4], 4294967168 }
  0x8d   :  { %81 = vsyncpa [#allocation3], 1 }
  0x8e   :  { %82 = vsyncpa [#allocation4], 1 }

</bundles_post_ra>
